<compile_context>
chip_gen: v7x
topology: tpu7x:2x2x1
jax: 0.10.0
libtpu: 0.0.40
codegen_flags: <defaults>
</compile_context>

<pallas_src>
import functools
import math

import jax
import jax.numpy as jnp
from jax import lax
from jax.experimental import pallas as pl
from jax.experimental.pallas import tpu as pltpu


def _round_up(x, m):
    return (x + m - 1) // m * m


# dtype-native sublane multiples (f32 -> 8, bf16 -> 16, int8/fp8 -> 32)
_SUBLANE = {4: 8, 2: 16, 1: 32}


def _proj_gelu_ln_kernel(x_ref, w_ref, b_ref, gamma_ref, beta_ref, o_ref):
    # x: [TN, D]   w: [D, P]   b/gamma/beta: [1, P]   o: [TN, P]
    # Matmul in native dtype; MXU accumulates in f32.
    y = jnp.dot(x_ref[...], w_ref[...], preferred_element_type=jnp.float32)
    y = y + b_ref[...].astype(jnp.float32)

    # Exact GELU (matches torch nn.GELU() default): 0.5*y*(1+erf(y/sqrt(2))).
    g = 0.5 * y * (1.0 + lax.erf(y * (1.0 / math.sqrt(2.0))))

    # LayerNorm over the real (unpadded) projection dim.
    mean = jnp.mean(g, axis=-1, keepdims=True)
    diff = g - mean
    var = jnp.mean(diff * diff, axis=-1, keepdims=True)
    norm = diff * lax.rsqrt(var + 1e-5)

    out = norm * gamma_ref[...].astype(jnp.float32) + beta_ref[...].astype(jnp.float32)
    o_ref[...] = out.astype(o_ref.dtype)


def _vmem_caps():
    """Generation-aware (scoped VMEM limit, usable budget) in bytes."""
    try:
        cap = int(pltpu.get_tpu_info().vmem_capacity_bytes)
    except Exception:  # interpret mode / unknown chip: assume the smallest (v7x)
        cap = 64 * 1024 * 1024
    limit = max(32 * 1024 * 1024, min(cap // 2, cap - 16 * 1024 * 1024))
    budget = int(limit * 0.8)          # headroom for Mosaic internal scratch
    return limit, budget


def _project_one(x, w_t, b, gamma, beta, *, tile_rows=1024):
    """LayerNorm(GELU(x @ w_t + b)) as one fused pallas_call at native shapes."""
    n, d = x.shape
    p = w_t.shape[1]
    dtype = x.dtype
    itemsize = jnp.dtype(dtype).itemsize
    sub = _SUBLANE.get(itemsize, 8)

    vmem_limit, vmem_budget = _vmem_caps()

    # VMEM footprint estimates use the padded-in-VMEM tile sizes (lane->128).
    d_vm = _round_up(d, 128)
    p_vm = _round_up(p, 128)
    resident = 2 * _round_up(d, sub) * p_vm * itemsize + 6 * p_vm * 4   # weight(+params)
    bytes_per_row = (2 * d_vm * itemsize          # double-buffered x tile
                     + 2 * p_vm * itemsize        # double-buffered out tile
                     + 3 * p_vm * 4)              # f32 GELU/LN intermediates
    avail = max(vmem_budget - resident, sub * bytes_per_row)
    max_tn = max(sub, (avail // bytes_per_row) // sub * sub)

    tn = min(_round_up(tile_rows, sub), max_tn, _round_up(n, sub))
    tn = max(tn, sub)
    n_pad = _round_up(n, tn)                      # at most one extra row tile
    if n_pad != n:
        x = jnp.pad(x, ((0, n_pad - n), (0, 0)))  # tiny row-only pad

    w = w_t.astype(dtype)                         # native dtype to the MXU
    b2 = b.reshape(1, p).astype(jnp.float32)
    g2 = gamma.reshape(1, p).astype(jnp.float32)
    be2 = beta.reshape(1, p).astype(jnp.float32)

    out = pl.pallas_call(
        _proj_gelu_ln_kernel,
        out_shape=jax.ShapeDtypeStruct((n_pad, p), dtype),
        grid=(n_pad // tn,),
        in_specs=[
            # x: new row tile every grid step
            pl.BlockSpec((tn, d), lambda t: (t, 0)),
            # weight / bias / shared LN params: VMEM-resident across row tiles
            pl.BlockSpec((d, p), lambda t: (0, 0)),
            pl.BlockSpec((1, p), lambda t: (0, 0)),
            pl.BlockSpec((1, p), lambda t: (0, 0)),
            pl.BlockSpec((1, p), lambda t: (0, 0)),
        ],
        out_specs=pl.BlockSpec((tn, p), lambda t: (t, 0)),
        compiler_params=pltpu.CompilerParams(
            dimension_semantics=("parallel",),    # row tiles shard across v7x TCs
            vmem_limit_bytes=int(vmem_limit)),
        cost_estimate=pl.CostEstimate(
            flops=2 * n_pad * d * p,
            transcendentals=n_pad * p,
            bytes_accessed=(n_pad * d * itemsize + d * p * itemsize
                            + n_pad * p * itemsize + 3 * p * 4),
        ),
    )(x, w, b2, g2, be2)

    return out if n_pad == n else out[:n]


def init_params(feature_dims, projection_dim, seed=0):
    """Per-feature Linear params + ONE shared LayerNorm (as in the torch module)."""
    params = {}
    key = jax.random.PRNGKey(seed)
    for k, d_in in feature_dims.items():
        key, kw, kb = jax.random.split(key, 3)
        bound = 1.0 / math.sqrt(d_in)
        # W stored already transposed: [D_in, P]
        w_t = jax.random.uniform(kw, (d_in, projection_dim), jnp.float32, -bound, bound)
        b = jax.random.uniform(kb, (projection_dim,), jnp.float32, -bound, bound)
        params[k] = (w_t, b)
    ln = (jnp.ones((projection_dim,), jnp.float32),    # LayerNorm weight
          jnp.zeros((projection_dim,), jnp.float32))   # LayerNorm bias
    return params, ln


def feature_projection(features, params, ln, projection_dim, *, tile_rows=1024):
    """Forward pass of FeatureProjection: per-feature fused kernels + concat."""
    gamma, beta = ln
    outs = [
        _project_one(features[k], params[k][0], params[k][1], gamma, beta,
                     tile_rows=tile_rows)
        for k in features
    ]
    # torch.cat along dim 0 for 2/3 modalities (plain XLA glue).
    if len(outs) in (2, 3):
        return jnp.concatenate(outs, axis=0)
    # Mirrors the torch module's else-branch (returns only the first feature).
    return outs[0]


def _reference(features, params, ln):
    """Pure-JAX reference mirroring the PyTorch forward (for self-check)."""
    gamma, beta = ln
    outs = []
    for k, v in features.items():
        w_t, b = params[k]
        y = v.astype(jnp.float32) @ w_t + b
        g = 0.5 * y * (1.0 + lax.erf(y * (1.0 / math.sqrt(2.0))))
        mean = jnp.mean(g, axis=-1, keepdims=True)
        var = jnp.mean((g - mean) ** 2, axis=-1, keepdims=True)
        outs.append((g - mean) * lax.rsqrt(var + 1e-5) * gamma + beta)
    if len(outs) in (2, 3):
        return jnp.concatenate(outs, axis=0)
    return outs[0]


if __name__ == "__main__":
    projection_dim = 32
    feature_dims = {"audio": 16, "text": 24}   # two modalities -> cat of 2

    key = jax.random.PRNGKey(0)
    k1, k2 = jax.random.split(key)
    features = {
        "audio": jax.random.normal(k1, (8, feature_dims["audio"]), jnp.float32),
        "text": jax.random.normal(k2, (8, feature_dims["text"]), jnp.float32),
    }

    params, ln = init_params(feature_dims, projection_dim, seed=0)

    out = feature_projection(features, params, ln, projection_dim)
    jax.block_until_ready(out)
    assert out.shape == (16, projection_dim), out.shape

    ref = _reference(features, params, ln)
    assert jnp.allclose(out, ref.astype(out.dtype), atol=2e-5, rtol=2e-5), (
        float(jnp.max(jnp.abs(out - ref))))

    print("KERNEL_OK")
</pallas_src>

<mosaic_0001>
module attributes {stable_mosaic.version = 11 : i64} {
  func.func @_proj_gelu_ln_kernel(%arg0: i32, %arg1: memref<8x16xf32, #tpu.memory_space<vmem>>, %arg2: memref<16x32xf32, #tpu.memory_space<vmem>>, %arg3: memref<1x32xf32, #tpu.memory_space<vmem>>, %arg4: memref<1x32xf32, #tpu.memory_space<vmem>>, %arg5: memref<1x32xf32, #tpu.memory_space<vmem>>, %arg6: memref<8x32xf32, #tpu.memory_space<vmem>>) attributes {dimension_semantics = [#tpu.dimension_semantics<parallel>], iteration_bounds = array<i64: 1>, scalar_prefetch = 0 : i64, scratch_operands = 0 : i64, tpu.core_type = #tpu.core_type<tc>, window_params = [{transform_indices = @transform_0, window_bounds = array<i64: 8, 16>}, {pipeline_mode = #tpu.pipeline_mode<synchronous>, transform_indices = @transform_1, window_bounds = array<i64: 16, 32>}, {pipeline_mode = #tpu.pipeline_mode<synchronous>, transform_indices = @transform_2, window_bounds = array<i64: 1, 32>}, {pipeline_mode = #tpu.pipeline_mode<synchronous>, transform_indices = @transform_3, window_bounds = array<i64: 1, 32>}, {pipeline_mode = #tpu.pipeline_mode<synchronous>, transform_indices = @transform_4, window_bounds = array<i64: 1, 32>}, {transform_indices = @transform_5, window_bounds = array<i64: 8, 32>}]} {
    %c0 = arith.constant 0 : index
    %c0_0 = arith.constant 0 : index
    %0 = vector.load %arg1[%c0, %c0_0] : memref<8x16xf32, #tpu.memory_space<vmem>>, vector<8x16xf32>
    %c0_1 = arith.constant 0 : index
    %c0_2 = arith.constant 0 : index
    %1 = vector.load %arg2[%c0_1, %c0_2] : memref<16x32xf32, #tpu.memory_space<vmem>>, vector<16x32xf32>
    %cst = arith.constant dense<0.000000e+00> : vector<8x32xf32>
    %2 = tpu.matmul %0, %1, %cst {dimension_numbers = #tpu.dot_dimension_numbers<[1], [0], [0], [1], [0, 0, 1, 1], [], []>} : vector<8x16xf32>, vector<16x32xf32>, vector<8x32xf32> -> vector<8x32xf32>
    %c0_3 = arith.constant 0 : index
    %c0_4 = arith.constant 0 : index
    %3 = vector.load %arg3[%c0_3, %c0_4] : memref<1x32xf32, #tpu.memory_space<vmem>>, vector<1x32xf32>
    %4 = vector.broadcast %3 : vector<1x32xf32> to vector<8x32xf32>
    %5 = arith.addf %2, %4 : vector<8x32xf32>
    %cst_5 = arith.constant 5.000000e-01 : f32
    %6 = vector.broadcast %cst_5 : f32 to vector<8x32xf32>
    %7 = arith.mulf %6, %5 : vector<8x32xf32>
    %cst_6 = arith.constant 0.707106769 : f32
    %8 = vector.broadcast %cst_6 : f32 to vector<8x32xf32>
    %9 = arith.mulf %5, %8 : vector<8x32xf32>
    %10 = math.erf %9 : vector<8x32xf32>
    %cst_7 = arith.constant 1.000000e+00 : f32
    %11 = vector.broadcast %cst_7 : f32 to vector<8x32xf32>
    %12 = arith.addf %11, %10 : vector<8x32xf32>
    %13 = arith.mulf %7, %12 : vector<8x32xf32>
    %cst_8 = arith.constant dense<0.000000e+00> : vector<8xf32>
    %14 = vector.multi_reduction <add>, %13, %cst_8 [1] : vector<8x32xf32> to vector<8xf32>
    %15 = vector.shape_cast %14 : vector<8xf32> to vector<8x1xf32>
    %cst_9 = arith.constant 3.200000e+01 : f32
    %16 = vector.broadcast %cst_9 : f32 to vector<8x1xf32>
    %17 = arith.divf %15, %16 : vector<8x1xf32>
    %18 = vector.broadcast %17 : vector<8x1xf32> to vector<8x32xf32>
    %19 = arith.subf %13, %18 : vector<8x32xf32>
    %20 = arith.mulf %19, %19 : vector<8x32xf32>
    %cst_10 = arith.constant dense<0.000000e+00> : vector<8xf32>
    %21 = vector.multi_reduction <add>, %20, %cst_10 [1] : vector<8x32xf32> to vector<8xf32>
    %22 = vector.shape_cast %21 : vector<8xf32> to vector<8x1xf32>
    %cst_11 = arith.constant 3.200000e+01 : f32
    %23 = vector.broadcast %cst_11 : f32 to vector<8x1xf32>
    %24 = arith.divf %22, %23 : vector<8x1xf32>
    %cst_12 = arith.constant 9.99999974E-6 : f32
    %25 = vector.broadcast %cst_12 : f32 to vector<8x1xf32>
    %26 = arith.addf %24, %25 : vector<8x1xf32>
    %27 = math.rsqrt %26 : vector<8x1xf32>
    %28 = vector.broadcast %27 : vector<8x1xf32> to vector<8x32xf32>
    %29 = arith.mulf %19, %28 : vector<8x32xf32>
    %c0_13 = arith.constant 0 : index
    %c0_14 = arith.constant 0 : index
    %30 = vector.load %arg4[%c0_13, %c0_14] : memref<1x32xf32, #tpu.memory_space<vmem>>, vector<1x32xf32>
    %31 = vector.broadcast %30 : vector<1x32xf32> to vector<8x32xf32>
    %32 = arith.mulf %29, %31 : vector<8x32xf32>
    %c0_15 = arith.constant 0 : index
    %c0_16 = arith.constant 0 : index
    %33 = vector.load %arg5[%c0_15, %c0_16] : memref<1x32xf32, #tpu.memory_space<vmem>>, vector<1x32xf32>
    %34 = vector.broadcast %33 : vector<1x32xf32> to vector<8x32xf32>
    %35 = arith.addf %32, %34 : vector<8x32xf32>
    %c0_17 = arith.constant 0 : index
    %c0_18 = arith.constant 0 : index
    %36 = vector.load %arg6[%c0_17, %c0_18] : memref<8x32xf32, #tpu.memory_space<vmem>>, vector<8x32xf32>
    tpu.vector_store %arg6[%c0_17, %c0_18], %35 {strides = array<i32>} : memref<8x32xf32, #tpu.memory_space<vmem>>, vector<8x32xf32>,
    return
  }
  func.func @transform_0(%arg0: i32) -> (i32, i32) {
    %c0_i32 = arith.constant 0 : i32
    %c0_i32_0 = arith.constant 0 : i32
    return %arg0, %c0_i32 : i32, i32
  }
  func.func @transform_1(%arg0: i32) -> (i32, i32) {
    %c0_i32 = arith.constant 0 : i32
    %c0_i32_0 = arith.constant 0 : i32
    %c0_i32_1 = arith.constant 0 : i32
    return %c0_i32, %c0_i32_0 : i32, i32
  }
  func.func @transform_2(%arg0: i32) -> (i32, i32) {
    %c0_i32 = arith.constant 0 : i32
    %c0_i32_0 = arith.constant 0 : i32
    %c0_i32_1 = arith.constant 0 : i32
    return %c0_i32, %c0_i32_0 : i32, i32
  }
  func.func @transform_3(%arg0: i32) -> (i32, i32) {
    %c0_i32 = arith.constant 0 : i32
    %c0_i32_0 = arith.constant 0 : i32
    %c0_i32_1 = arith.constant 0 : i32
    return %c0_i32, %c0_i32_0 : i32, i32
  }
  func.func @transform_4(%arg0: i32) -> (i32, i32) {
    %c0_i32 = arith.constant 0 : i32
    %c0_i32_0 = arith.constant 0 : i32
    %c0_i32_1 = arith.constant 0 : i32
    return %c0_i32, %c0_i32_0 : i32, i32
  }
  func.func @transform_5(%arg0: i32) -> (i32, i32) {
    %c0_i32 = arith.constant 0 : i32
    %c0_i32_0 = arith.constant 0 : i32
    return %arg0, %c0_i32 : i32, i32
  }
}

</mosaic_0001>

<bundles_post_ra>
// kernel: tpu_custom_call.1
= control target key start
LH: loop header
LB: loop body
LE: loop exit
PB: predicated region body
PF: predicated region fallthrough
CT: control target
= control target key end

     0   :  { %10 = vsyncpa [#allocation3], 0  ;;  %s378_s0 = inlined_call_operand.hbm [shape: f32[8,16], index: 0, kind: input, shape index: {}]   ;;  %s379_s1 = inlined_call_operand.hbm [shape: f32[16,32], index: 1, kind: input, shape index: {}]   ;;  %s380_s2 = inlined_call_operand.vmem [shape: f32[1,32], index: 2, kind: input, shape index: {}]   ;;  %s381_s3 = inlined_call_operand.vmem [shape: f32[1,32], index: 3, kind: input, shape index: {}]   ;;  %s382_s4 = inlined_call_operand.vmem [shape: f32[1,32], index: 4, kind: input, shape index: {}]   ;;  %s383_s5 = inlined_call_operand.hbm [shape: f32[8,32], index: 5, kind: output, shape index: {}]  }
   0x1   :  { %11 = vsyncpa [#allocation6], 0 }
   0x2   :  { %12 = vsyncpa [#allocation4], 0  ;;  %s285_s18 = smov [#allocation2]   ;;  %s286_s20 = smov [#allocation5]  }
   0x3   :  { %s19_s19 = sshll.u32 %s285_s18, 4  ;;  %s28_s21 = sshll.u32 %s286_s20, 4  ;;  %s20_s19 = int_to_ptr.vmem [resolvable:$true] %s19_s19  ;;  %s323_s21 = int_to_ptr.vmem [resolvable:$true] %s28_s21 }
   0x4   :  { %s213_s24 = scalar_lea.hbm %s378_s0, 128 }
   0x5   :  { %p214_p0 = scmp.ne.s32.totalorder %s378_s0, %s213_s24  ;;  %p217_p1 = scmp.lt.u32.totalorder %s213_s24, %s378_s0 }
   0x7   :  { %p219_p2 = pnand %p217_p1, %p214_p0 }
   0x9   :  { %222 = shalt.err (!%p219_p2)
}
   0xa   :  { %s223_s29 = scalar_lea.vmem %s20_s19, 128  ;;  %p228_p4 = scmp.lt.s32.totalorder %s20_s19, %s20_s19 }
   0xb   :  { %p224_p3 = scmp.ne.s32.totalorder %s20_s19, %s223_s29  ;;  %p229_p5 = scmp.lt.s32.totalorder %s223_s29, %s223_s29 }
   0xd   :  { %p230_p6 = por %p229_p5, %p228_p4 }
   0xf   :  { %p231_p7 = pnand %p230_p6, %p224_p3 }
  0x11   :  { %234 = shalt.err (!%p231_p7)
}
  0x12   :  { %22 = dma.hbm_to_vmem [thread:$0]  %s378_s0, 128, %s20_s19, [#allocation3]  }
  0x13   :  { %s235_s9 = scalar_lea.hbm %s379_s1, 256 }
  0x14   :  { %p236_p8 = scmp.ne.s32.totalorder %s379_s1, %s235_s9  ;;  %p239_p9 = scmp.lt.u32.totalorder %s235_s9, %s379_s1 }
  0x16   :  { %p241_p10 = pnand %p239_p9, %p236_p8 }
  0x18   :  { %244 = shalt.err (!%p241_p10)
}
  0x19   :  { %s245_s14 = scalar_lea.vmem %s323_s21, 256  ;;  %p250_p12 = scmp.lt.s32.totalorder %s323_s21, %s323_s21 }
  0x1a   :  { %p246_p11 = scmp.ne.s32.totalorder %s323_s21, %s245_s14  ;;  %p251_p13 = scmp.lt.s32.totalorder %s245_s14, %s245_s14 }
  0x1c   :  { %p252_p0 = por %p251_p13, %p250_p12 }
  0x1e   :  { %p253_p1 = pnand %p252_p0, %p246_p11 }
  0x20   :  { %256 = shalt.err (!%p253_p1)
}
  0x21   :  { %s287_s0 = smov 128   ;;  %s288_s15 = smov 8  }
  0x22   :  { %34 = dma.hbm_to_vmem [thread:$0]  %s379_s1, 256, %s323_s21, [#allocation6], %s287_s0, %s287_s0, %s288_s15  }
  0x23   :  { %279 = dma.done.wait [#allocation3], 128  }
  0x24   :  { %280 = vsyncadd [#allocation3], 4294967168 }
  0x25   :  { %281 = dma.done.wait [#allocation6], 256  }
  0x26   :  { %282 = vsyncadd [#allocation6], 4294967040  ;;  %v289_v0 = vmov 0.0|0.0   ;;  %vm290_vm0 = vmmov 0   ;;  %v291_v1 = vmov 0.0   ;;  %v48_v2 = vld [vmem:[#allocation5] sm:$0xff] }
  0x27   :  { %198 = vmatprep.subr.bf16.mxu0 %v289_v0  ;;  %195 = vmatprep.mubr.msk.f32.mxu0 %vm290_vm0, %v291_v1  ;;  %v49_v3 = vld [vmem:[#allocation5 + $0x8] sm:$0xff]  ;;  %v47_v5 = vld [vmem:[#allocation2] sm:$0xff]  ;;  %vm57_vm1 = vcmask 130048   ;;  %vm136_vm2 = vcmask 261120   ;;  %s292_s22 = smov [#allocation7]  }
  0x28   :  { %v199_v4 = vpack.c.bf16 %v49_v3, %v48_v2  ;;  %v184_v6 = vld [vmem:[%s380_s2] ss:$0 sm:$0xff]  ;;  %s174_s23 = sshll.u32 %s292_s22, 4  ;;  %s175_s23 = int_to_ptr.vmem [resolvable:$true] %s174_s23 }
  0x29   :  { %v186_v25 = vld [vmem:[%s381_s3] ss:$0 sm:$0xff]  ;;  %s257_s24 = scalar_lea.vmem %s175_s23, 128  ;;  %p262_p3 = scmp.lt.s32.totalorder %s175_s23, %s175_s23 }
  0x2a   :  { %200 = vmatpush3.bf16.msra.mxu0 %v199_v4  ;;  %v187_v27 = vld [vmem:[%s382_s4] ss:$0 sm:$0xff]  ;;  %p258_p2 = scmp.ne.s32.totalorder %s175_s23, %s257_s24  ;;  %p263_p4 = scmp.lt.s32.totalorder %s257_s24, %s257_s24 }
  0x2c   :  { %p264_p5 = por %p263_p4, %p262_p3 }
  0x2d   :  { %196 = vmatmul.mubr.msk.f32.vlgmr.msra.gmra.mrb[0].mxu0 %vm57_vm1, %v47_v5 }
  0x2e   :  { %p265_p6 = pnand %p264_p5, %p258_p2 }
 0x100   :  { %v127_v7 = vpop.f32.mrb[0].mxu0 }
 0x101   :  { %v128_v8 = vadd.f32 %v184_v6, %v127_v7  ;;  %v197_v9 = vpop.f32.mrb[1].mxu0 }
 0x103   :  { %v132_v10 = vmul.f32 0.70710677, %v128_v8  ;;  %v131_v12 = vmul.f32 0.5, %v128_v8 }
 0x105   :  { %209 = verf.f32 %v132_v10 }
 0x10f   :  { %v210_v11 = vpop.eup %209 }
 0x110   :  { %v134_v13 = vadd.f32 1.0, %v210_v11 }
 0x112   :  { %v135_v14 = vmul.f32 %v134_v13, %v131_v12 }
 0x114   :  { %v137_v15 = vsel %vm136_vm2, %v135_v14, 0.0 }
 0x115   :  { %138 = vadd.xlane.f32.xlu0 %v137_v15 }
 0x1a2   :  { %v139_v16 = vpop.xlane.xlu0 %138 }
 0x1a3   :  { %v141_v17 = vmul.f32 0.03125, %v139_v16 }
 0x1a5   :  { %v142_v18 = vsub.f32 %v135_v14, %v141_v17 }
 0x1a7   :  { %v143_v19 = vmul.f32 %v142_v18, %v142_v18 }
 0x1a9   :  { %v144_v20 = vsel %vm136_vm2, %v143_v19, 0.0 }
 0x1aa   :  { %145 = vadd.xlane.f32.xlu0 %v144_v20 }
 0x237   :  { %v146_v21 = vpop.xlane.xlu0 %145 }
 0x238   :  { %v147_v22 = vmul.f32 0.03125, %v146_v21 }
 0x23a   :  { %v148_v23 = vadd.f32 1e-05, %v147_v22 }
 0x23c   :  { %211 = vrsqrt.f32 %v148_v23 }
 0x246   :  { %v212_v24 = vpop.eup %211 }
 0x247   :  { %v150_v26 = vmul.f32 %v212_v24, %v142_v18 }
 0x249   :  { %v158_v28 = vmul.f32 %v186_v25, %v150_v26 }
 0x24b   :  { %v166_v29 = vadd.f32 %v187_v27, %v158_v28 }
 0x24d   :  { %167 = vst.msk [vmem:[#allocation7] sm:$0xff] %vm136_vm2, %v166_v29 }
 0x24e   :  { %268 = shalt.err (!%p265_p6)
}
 0x24f   :  { %s269_s26 = scalar_lea.hbm %s383_s5, 128 }
 0x250   :  { %p270_p7 = scmp.ne.s32.totalorder %s383_s5, %s269_s26  ;;  %p273_p8 = scmp.lt.u32.totalorder %s269_s26, %s383_s5 }
 0x252   :  { %p275_p9 = pnand %p273_p8, %p270_p7 }
 0x254   :  { %278 = shalt.err (!%p275_p9)
}
 0x255   :  { %177 = dma.vmem_to_hbm [thread:$0]  %s175_s23, 128, %s383_s5, [#allocation4]  }
 0x256   :  { %283 = dma.done.wait [#allocation4], 128  }
 0x257   :  { %284 = vsyncadd [#allocation4], 4294967168 }
 0x258   :  { %181 = vsyncpa [#allocation3], 1 }
 0x259   :  { %182 = vsyncpa [#allocation6], 1 }
 0x25a   :  { %183 = vsyncpa [#allocation4], 1 }

</bundles_post_ra>
